<compile_context>
chip_gen: v7x
topology: tpu7x:2x2x1
jax: 0.10.0
libtpu: 0.0.40
codegen_flags: <defaults>
</compile_context>

<pallas_src>
import numpy as np
import jax
import jax.numpy as jnp
from jax import lax
from jax.experimental import pallas as pl
from jax.experimental.pallas import tpu as pltpu

# TODO(synk): linear_sum_assignment (the Hungarian solve itself) is a sequential,
# data-dependent combinatorial algorithm with no clean Pallas equivalent; it runs
# on the host (scipy) on the kernel-produced per-batch cost blocks, mirroring the
# PyTorch module's .cpu() + scipy path.
from scipy.optimize import linear_sum_assignment


def _round_up(n, m):
    return ((n + m - 1) // m) * m


def _cdiv(a, b):
    return (a + b - 1) // b


def _pick_tile(dim, align, tile_max):
    """Tile size: multiple of `align`, roughly <= tile_max, minimizing padding."""
    dim = max(int(dim), 1)
    if dim <= tile_max:
        return _round_up(dim, align)
    ntiles = _cdiv(dim, tile_max)
    return _round_up(_cdiv(dim, ntiles), align)


def _sq_cost_kernel(y_ref, x_ref, y2_ref, x2_ref, o_ref):
    """One (ts, tq) tile of per-batch squared L2 distances (transposed layout).

    y_ref : [ts, D]  target tile          y2_ref: [ts, 1]  ||y||^2
    x_ref : [tq, D]  prediction tile      x2_ref: [1, tq]  ||x||^2
    o_ref : [ts, tq] with o[t, q] = ||y_t - x_q||^2
    """
    # y @ x^T on the MXU, contracting the feature dim of both operands
    # (no transpose of either tile; MXU is nowhere near the critical slot).
    yx = lax.dot_general(
        y_ref[...], x_ref[...],
        dimension_numbers=(((1,), (1,)), ((), ())),
        preferred_element_type=jnp.float32,
    )                                                        # [ts, tq]
    # Squared distance only; sqrt happens on the tiny host slices that feed the
    # Hungarian solver (keeps the single EUP slot free, esp. on v7x).
    o_ref[...] = jnp.maximum(y2_ref[...] - 2.0 * yx + x2_ref[...], 0.0)


def batched_sq_cdist_pallas(x, y, *, ts_max=1024, tq_max=1024):
    """Per-batch (block-diagonal) pairwise squared L2 distances.

    x: [B, Nq, D] predictions, y: [B, S, D] zero-row-padded packed targets.
    Returns [B, S_pad, Q_pad] float32 with out[b, t, q] = ||y[b, t] - x[b, q]||^2.
    Transposed layout: the (large) prediction axis is lane-dense, the (small)
    target axis only pads to a sublane multiple of 8.
    """
    B, Nq, D = x.shape
    _, S, _ = y.shape
    x = x.astype(jnp.float32)
    y = y.astype(jnp.float32)

    ts = _pick_tile(S, 8, ts_max)
    tq = _pick_tile(Nq, 128, tq_max)
    n_s = _cdiv(S, ts)
    n_q = _cdiv(Nq, tq)
    # v7x megacore: keep >= 2 parallel grid steps when the problem allows it.
    if B * n_s * n_q == 1 and Nq > 128:
        tq = _round_up(_cdiv(Nq, 2), 128)
        n_q = _cdiv(Nq, tq)
    s_pad = n_s * ts
    q_pad = n_q * tq

    xp = jnp.pad(x, ((0, 0), (0, q_pad - Nq), (0, 0)))        # [B, Qp, D]
    yp = jnp.pad(y, ((0, 0), (0, s_pad - S), (0, 0)))         # [B, Sp, D]
    x2 = jnp.sum(xp * xp, axis=-1)[:, None, :]                # [B, 1, Qp]
    y2 = jnp.sum(yp * yp, axis=-1, keepdims=True)             # [B, Sp, 1]

    grid = (B, n_s, n_q)
    cost = pl.CostEstimate(
        flops=2 * B * s_pad * q_pad * D,
        transcendentals=0,
        bytes_accessed=4 * B * (s_pad * q_pad + (s_pad + q_pad) * (D + 1)),
    )

    out = pl.pallas_call(
        _sq_cost_kernel,
        out_shape=jax.ShapeDtypeStruct((B, s_pad, q_pad), jnp.float32),
        grid_spec=pltpu.PrefetchScalarGridSpec(
            num_scalar_prefetch=0,
            grid=grid,
            in_specs=[
                pl.BlockSpec((None, ts, D), lambda b, i, j: (b, i, 0)),   # targets
                pl.BlockSpec((None, tq, D), lambda b, i, j: (b, j, 0)),   # preds
                pl.BlockSpec((None, ts, 1), lambda b, i, j: (b, i, 0)),   # ||y||^2
                pl.BlockSpec((None, 1, tq), lambda b, i, j: (b, 0, j)),   # ||x||^2
            ],
            out_specs=pl.BlockSpec((None, ts, tq), lambda b, i, j: (b, i, j)),
        ),
        compiler_params=pltpu.CompilerParams(
            dimension_semantics=("parallel", "parallel", "parallel"),
            vmem_limit_bytes=48 * 1024 * 1024,   # <= ~48 MiB: safe on v7x's 64 MiB
        ),
        cost_estimate=cost,
    )(yp, xp, y2, x2)
    return out


class HungarianMatcher:
    """JAX/Pallas port of the PyTorch HungarianMatcher (forward only)."""

    def __call__(self, outputs, targets):
        """
        outputs: jnp array [B, num_out_segments, D]
        targets: list (len B) of jnp arrays [num_gt_segments_i, D]
        Returns: list of (index_i, index_j) int64 numpy arrays, one per batch
                 element, with len == min(num_out_segments, num_gt_segments_i).
        """
        B, num_out_segments = outputs.shape[:2]
        sizes = [int(t.shape[0]) for t in targets]
        max_sz = max(sizes) if sizes else 0

        # Degenerate case: no ground-truth segments at all.
        if max_sz == 0:
            empty = np.zeros((0,), dtype=np.int64)
            return [(empty, empty) for _ in range(B)]

        # Pack the ragged target list into [B, max_sz, D] (zero rows as padding).
        # Only the block-diagonal [Nq, sz_i] cost blocks are ever computed; the
        # reference's full [B*Nq, sum(sz_i)] matrix is never materialized.
        y_packed = jnp.stack(
            [jnp.pad(jnp.asarray(t, dtype=jnp.float32),
                     ((0, max_sz - int(t.shape[0])), (0, 0)))
             for t in targets],
            axis=0,
        )

        # Hot path: per-batch squared-distance blocks on TPU (transposed layout
        # [B, max_sz_pad, Nq_pad], prediction axis lane-dense).
        cost_sq = batched_sq_cdist_pallas(
            jnp.asarray(outputs, dtype=jnp.float32), y_packed)

        # Kick off async D2H transfers of exactly the [sz_i, Nq] blocks the
        # solver needs, so scipy on batch i overlaps the transfer of batch i+1.
        per_batch = []
        for i, sz in enumerate(sizes):
            s = cost_sq[i, :sz, :num_out_segments]
            if sz > 0 and hasattr(s, "copy_to_host_async"):
                s.copy_to_host_async()
            per_batch.append(s)

        indices = []
        for s, sz in zip(per_batch, sizes):
            if sz == 0:
                row_ind = np.zeros((0,), dtype=np.int64)
                col_ind = np.zeros((0,), dtype=np.int64)
            else:
                # sqrt on the tiny host block -> solver sees true L2 distances,
                # and the [Nq, sz] orientation matches the reference exactly.
                c_i = np.sqrt(np.maximum(np.asarray(s), 0.0)).T
                row_ind, col_ind = linear_sum_assignment(c_i)
            indices.append((np.asarray(row_ind, dtype=np.int64),
                            np.asarray(col_ind, dtype=np.int64)))
        return indices


if __name__ == "__main__":
    key = jax.random.PRNGKey(0)
    k_out, k_t0, k_t1 = jax.random.split(key, 3)

    B, num_out_segments, D = 2, 8, 8          # D == outdim * lambda
    outputs = jax.random.normal(k_out, (B, num_out_segments, D), dtype=jnp.float32)
    targets = [
        jax.random.normal(k_t0, (3, D), dtype=jnp.float32),
        jax.random.normal(k_t1, (5, D), dtype=jnp.float32),
    ]

    matcher = HungarianMatcher()
    indices = matcher(outputs, targets)

    # Run the kernel once directly and block on the device result.
    max_sz = max(t.shape[0] for t in targets)
    y_packed = jnp.stack(
        [jnp.pad(t, ((0, max_sz - t.shape[0]), (0, 0))) for t in targets], axis=0)
    cost_sq = batched_sq_cdist_pallas(outputs, y_packed)
    jax.block_until_ready(cost_sq)

    # Sanity check each per-batch block against a pure-JAX reference cdist.
    for b, t in enumerate(targets):
        sz = t.shape[0]
        ref = jnp.sqrt(jnp.maximum(jnp.sum(
            (outputs[b][:, None, :] - t[None, :, :]) ** 2, axis=-1), 0.0))   # [Nq, sz]
        got = np.sqrt(np.maximum(
            np.asarray(cost_sq[b, :sz, :num_out_segments]), 0.0)).T          # [Nq, sz]
        assert np.allclose(got, np.asarray(ref), atol=1e-4), "cdist block mismatch"

    for (ri, ci), sz in zip(indices, [3, 5]):
        assert len(ri) == len(ci) == min(num_out_segments, sz)
        assert ri.dtype == np.int64 and ci.dtype == np.int64

    print("KERNEL_OK")
</pallas_src>

<mosaic_0001>
module attributes {stable_mosaic.version = 11 : i64} {
  func.func @_sq_cost_kernel(%arg0: i32, %arg1: i32, %arg2: i32, %arg3: memref<1x8x8xf32, #tpu.memory_space<vmem>>, %arg4: memref<1x128x8xf32, #tpu.memory_space<vmem>>, %arg5: memref<1x8x1xf32, #tpu.memory_space<vmem>>, %arg6: memref<1x1x128xf32, #tpu.memory_space<vmem>>, %arg7: memref<1x8x128xf32, #tpu.memory_space<vmem>>) attributes {dimension_semantics = [#tpu.dimension_semantics<parallel>, #tpu.dimension_semantics<parallel>, #tpu.dimension_semantics<parallel>], iteration_bounds = array<i64: 2, 1, 1>, scalar_prefetch = 0 : i64, scratch_operands = 0 : i64, tpu.core_type = #tpu.core_type<tc>, window_params = [{transform_indices = @transform_0, window_bounds = array<i64: 1, 8, 8>}, {transform_indices = @transform_1, window_bounds = array<i64: 1, 128, 8>}, {transform_indices = @transform_2, window_bounds = array<i64: 1, 8, 1>}, {transform_indices = @transform_3, window_bounds = array<i64: 1, 1, 128>}, {transform_indices = @transform_4, window_bounds = array<i64: 1, 8, 128>}]} {
    %c0 = arith.constant 0 : index
    %c0_0 = arith.constant 0 : index
    %c0_1 = arith.constant 0 : index
    %0 = vector.load %arg3[%c0, %c0_0, %c0_1] : memref<1x8x8xf32, #tpu.memory_space<vmem>>, vector<1x8x8xf32>
    %1 = vector.shape_cast %0 : vector<1x8x8xf32> to vector<8x8xf32>
    %c0_2 = arith.constant 0 : index
    %c0_3 = arith.constant 0 : index
    %c0_4 = arith.constant 0 : index
    %2 = vector.load %arg4[%c0_2, %c0_3, %c0_4] : memref<1x128x8xf32, #tpu.memory_space<vmem>>, vector<1x128x8xf32>
    %3 = vector.shape_cast %2 : vector<1x128x8xf32> to vector<128x8xf32>
    %cst = arith.constant dense<0.000000e+00> : vector<8x128xf32>
    %4 = tpu.matmul %1, %3, %cst {dimension_numbers = #tpu.dot_dimension_numbers<[1], [1], [0], [0], [0, 0, 1, 0], [], []>} : vector<8x8xf32>, vector<128x8xf32>, vector<8x128xf32> -> vector<8x128xf32>
    %c0_5 = arith.constant 0 : index
    %c0_6 = arith.constant 0 : index
    %c0_7 = arith.constant 0 : index
    %5 = vector.load %arg5[%c0_5, %c0_6, %c0_7] : memref<1x8x1xf32, #tpu.memory_space<vmem>>, vector<1x8x1xf32>
    %6 = vector.shape_cast %5 : vector<1x8x1xf32> to vector<8x1xf32>
    %cst_8 = arith.constant 2.000000e+00 : f32
    %7 = vector.broadcast %cst_8 : f32 to vector<8x128xf32>
    %8 = arith.mulf %7, %4 : vector<8x128xf32>
    %9 = vector.broadcast %6 : vector<8x1xf32> to vector<8x128xf32>
    %10 = arith.subf %9, %8 : vector<8x128xf32>
    %c0_9 = arith.constant 0 : index
    %c0_10 = arith.constant 0 : index
    %c0_11 = arith.constant 0 : index
    %11 = vector.load %arg6[%c0_9, %c0_10, %c0_11] : memref<1x1x128xf32, #tpu.memory_space<vmem>>, vector<1x1x128xf32>
    %12 = vector.shape_cast %11 : vector<1x1x128xf32> to vector<1x128xf32>
    %13 = vector.broadcast %12 : vector<1x128xf32> to vector<8x128xf32>
    %14 = arith.addf %10, %13 : vector<8x128xf32>
    %cst_12 = arith.constant 0.000000e+00 : f32
    %15 = vector.broadcast %cst_12 : f32 to vector<8x128xf32>
    %16 = arith.maximumf %14, %15 : vector<8x128xf32>
    %c0_13 = arith.constant 0 : index
    %c0_14 = arith.constant 0 : index
    %c0_15 = arith.constant 0 : index
    %17 = vector.load %arg7[%c0_13, %c0_14, %c0_15] : memref<1x8x128xf32, #tpu.memory_space<vmem>>, vector<1x8x128xf32>
    %18 = vector.shape_cast %17 : vector<1x8x128xf32> to vector<8x128xf32>
    %19 = vector.shape_cast %16 : vector<8x128xf32> to vector<1x8x128xf32>
    tpu.vector_store %arg7[%c0_13, %c0_14, %c0_15], %19 {strides = array<i32>} : memref<1x8x128xf32, #tpu.memory_space<vmem>>, vector<1x8x128xf32>,
    return
  }
  func.func @transform_0(%arg0: i32, %arg1: i32, %arg2: i32) -> (i32, i32, i32) {
    %c0_i32 = arith.constant 0 : i32
    %c0_i32_0 = arith.constant 0 : i32
    return %arg0, %arg1, %c0_i32 : i32, i32, i32
  }
  func.func @transform_1(%arg0: i32, %arg1: i32, %arg2: i32) -> (i32, i32, i32) {
    %c0_i32 = arith.constant 0 : i32
    %c0_i32_0 = arith.constant 0 : i32
    return %arg0, %arg2, %c0_i32 : i32, i32, i32
  }
  func.func @transform_2(%arg0: i32, %arg1: i32, %arg2: i32) -> (i32, i32, i32) {
    %c0_i32 = arith.constant 0 : i32
    %c0_i32_0 = arith.constant 0 : i32
    return %arg0, %arg1, %c0_i32 : i32, i32, i32
  }
  func.func @transform_3(%arg0: i32, %arg1: i32, %arg2: i32) -> (i32, i32, i32) {
    %c0_i32 = arith.constant 0 : i32
    %c0_i32_0 = arith.constant 0 : i32
    return %arg0, %c0_i32, %arg2 : i32, i32, i32
  }
  func.func @transform_4(%arg0: i32, %arg1: i32, %arg2: i32) -> (i32, i32, i32) {
    %c0_i32 = arith.constant 0 : i32
    return %arg0, %arg1, %arg2 : i32, i32, i32
  }
}

</mosaic_0001>

<bundles_post_ra>
// kernel: tpu_custom_call.1
= control target key start
LH: loop header
LB: loop body
LE: loop exit
PB: predicated region body
PF: predicated region fallthrough
CT: control target
= control target key end

     0   :  { %9 = vsyncpa [#allocation3], 0  ;;  %s1067_s0 = inlined_call_operand.vmem [shape: f32[2,8,8], index: 0, kind: input, shape index: {}]   ;;  %s1068_s1 = inlined_call_operand.vmem [shape: f32[2,128,8], index: 1, kind: input, shape index: {}]   ;;  %s1069_s2 = inlined_call_operand.vmem [shape: f32[2,8,1], index: 2, kind: input, shape index: {}]   ;;  %s1070_s3 = inlined_call_operand.vmem [shape: f32[2,1,128], index: 3, kind: input, shape index: {}]   ;;  %s1071_s4 = inlined_call_operand.hbm [shape: f32[2,8,128], index: 4, kind: output, shape index: {}]  }
   0x1   :  { %11 = vsyncpa [#allocation3 + $0x1], 0  ;;  %s896_s15 = smov 0   ;;  %s898_s16 = smov 0  }
   0x2   :  { %s900_s17 = smov 0   ;;  %s902_s18 = smov 0  }
   0x3   :  { %s904_s19 = smov 0   ;;  %s906_s20 = smov 0  }
   0x4 LB: > { %s609_s21 = sadd.s32 4294967295, %s864_s20   ;;  %s610_s22 = sadd.s32 4294967294, %s864_s20   ;;  %s864_s20 = sphi %s906_s20, %s17_s20   ;;  %s860_s19 = sphi %s904_s19, %s1080_s19   ;;  %s856_s18 = sphi %s902_s18, %s1079_s18   ;;  %s852_s17 = sphi %s900_s17, %s1078_s17   ;;  %s848_s16 = sphi %s898_s16, %s1077_s16   ;;  %s844_s15 = sphi %s896_s15, %s1076_s15  }
   0x5   : > { %s36_s23 = sadd.s32 1, %s860_s19  ;;  %s159_s24 = sadd.s32 1, %s852_s17 }
   0x6   : > { %p38_p0 = scmp.ge.s32.totalorder %s36_s23, 2  ;;  %p169_p1 = scmp.ne.s32.totalorder %s852_s17, %s848_s16 }
   0x7   : > { %p170_p2 = scmp.eq.s32.totalorder %s609_s21, 1  ;;  %p175_p3 = scmp.ne.s32.totalorder %s848_s16, %s844_s15 }
   0x8   : > { %s1082_s23 = smov (%p38_p0, %s36_s23), 0  ;;  %p176_p5 = scmp.eq.s32.totalorder %s610_s22, 1 }
   0x9   : > { %p936_p4 = por %p170_p2, %p169_p1  ;;  %s152_s26 = ssub.s32 %s860_s19, %s1082_s23 }
   0xa   : > { %p613_p6 = scmp.ge.s32.totalorder %s864_s20, 1  ;;  %p157_p7 = scmp.eq.s32.totalorder %s152_s26, 0 }
   0xb   : > { %p943_p8 = por %p176_p5, %p175_p3  ;;  %p236_p9 = scmp.lt.s32.totalorder %s864_s20, 3 }
   0xc   : > { %s949_s28 = scalar_select %p157_p7, %s852_s17, %s159_s24  }
   0xd   : > { %p237_p10 = pnand %p613_p6, %p236_p9 }
   0xe   : > { %p286_p11 = scmp.lt.s32.totalorder (!%p237_p10), %s856_s18, 1  ;;  %v866_v0 = vmov (!%p237_p10), 0.0|0.0   ;;  %vm867_vm0 = vmmov (!%p237_p10), 0   ;;  %v868_v1 = vmov (!%p237_p10), 0.0   ;;  %v869_v2 = vmov (!%p237_p10), 0   ;;  %s283_s21 = sand.u32 (!%p237_p10), 1, %s848_s16  }
   0xf   : > { %240 = sbr.rel (%p237_p10) target bundleno = 326 (0x146), region = 36  ;;  %694 = vmatprep.subr.bf16.mxu0 (!%p237_p10), %v866_v0  ;;  %691 = vmatprep.mubr.msk.f32.mxu0 (!%p237_p10), %vm867_vm0, %v868_v1  ;;  %vm333_vm1 = vcmask (!%p237_p10), 64512   ;;  %s614_s22 = sshll.u32 (!%p237_p10), %s283_s21, 3 }
  0x10   : > { %785 = vset.pattern.permute.xlu0 (!%p237_p10), %v869_v2  ;;  %vm965_vm2 = vmpackc.low (!%p237_p10), %vm333_vm1, %vm333_vm1  ;;  %s638_s5 = sshll.u32 (!%p237_p10), %s856_s18, 7  ;;  %s285_s6 = scalar_lea.vmem (!%p237_p10), [#allocation2], %s614_s22 }
  0x11   : > { %s1020_s10 = scalar_lea.hbm (!%p237_p10), %s1071_s4, %s638_s5 }
  0x16   : > { %s953_s29 = scalar_select %p286_p11, %s856_s18, 1 }
  0x17   : > { %s870_s18 = smov [#allocation2]  }
  0x18   : > { %s641_s30 = sshll.u32 %s953_s29, 7  ;;  %s615_s8 = sshll.u32 %s953_s29, 3 }
  0x19   : > { %s959_s7 = scalar_lea.vmem %s1068_s1, %s641_s30  ;;  %s309_s11 = scalar_lea.vmem %s1069_s2, %s615_s8 }
  0x1a   : > { %v317_v3 = vld [vmem:[%s959_s7] sm:$0xff]  ;;  %v318_v4 = vld [vmem:[%s959_s7 + $0x8] sm:$0xff]  ;;  %v319_v7 = vld [vmem:[%s959_s7 + $0x10] sm:$0xff]  ;;  %s292_s14 = scalar_lea.vmem %s1067_s0, %s615_s8  ;;  %s315_s30 = scalar_lea.vmem %s1070_s3, %s953_s29 }
  0x1b   : > { %v695_v6 = vpack.c.bf16 %v318_v4, %v317_v3  ;;  %v320_v8 = vld [vmem:[%s959_s7 + $0x18] sm:$0xff]  ;;  %v455_v9 = vld [vmem:[%s309_s11] sm:$0xff]  ;;  %v322_v12 = vld [vmem:[%s959_s7 + $0x28] sm:$0xff]  ;;  %s474_s29 = scalar_lea.sflag [#allocation3], %s283_s21  ;;  %s790_s12 = sshll.u32 %s870_s18, 4  ;;  %s791_s12 = int_to_ptr.vmem [resolvable:$false] %s790_s12 }
  0x1c   : > { %459 = vperm.xlu0 %785, %v455_v9   ;;  %v699_v10 = vpack.c.bf16 %v320_v8, %v319_v7  ;;  %v321_v11 = vld [vmem:[%s959_s7 + $0x20] sm:$0xff]  ;;  %v323_v14 = vld [vmem:[%s959_s7 + $0x30] sm:$0xff]  ;;  %v324_v15 = vld [vmem:[%s959_s7 + $0x38] sm:$0xff]  ;;  %s792_s13 = scalar_lea.vmem %s791_s12, 256 }
  0x1d   : > { %697 = vmatpush3.bf16.xpose.msk.msra.mxu0 %vm965_vm2, %v695_v6  ;;  %v703_v13 = vpack.c.bf16 %v322_v12, %v321_v11  ;;  %v707_v16 = vpack.c.bf16 %v324_v15, %v323_v14  ;;  %v325_v17 = vld [vmem:[%s959_s7 + $0x40] sm:$0xff]  ;;  %v326_v18 = vld [vmem:[%s959_s7 + $0x48] sm:$0xff]  ;;  %v327_v20 = vld [vmem:[%s959_s7 + $0x50] sm:$0xff] }
  0x1e   : > { %698 = vmatprep.subr.bf16.mxu0 %v866_v0  ;;  %v711_v19 = vpack.c.bf16 %v326_v18, %v325_v17  ;;  %v328_v21 = vld [vmem:[%s959_s7 + $0x58] sm:$0xff]  ;;  %v329_v23 = vld [vmem:[%s959_s7 + $0x60] sm:$0xff]  ;;  %v330_v24 = vld [vmem:[%s959_s7 + $0x68] sm:$0xff] }
  0x1f   : > { %v715_v22 = vpack.c.bf16 %v328_v21, %v327_v20  ;;  %v719_v25 = vpack.c.bf16 %v330_v24, %v329_v23  ;;  %v331_v26 = vld [vmem:[%s959_s7 + $0x70] sm:$0xff]  ;;  %v332_v27 = vld [vmem:[%s959_s7 + $0x78] sm:$0xff]  ;;  %v316_v29 = vld [vmem:[%s292_s14] sm:$0xff]  ;;  %s489_s7 = sshll.u32 %s285_s6, 4  ;;  %s1022_s7 = int_to_ptr.vmem [resolvable:$true] %s489_s7 }
  0x20   : > { %v723_v28 = vpack.c.bf16 %v332_v27, %v331_v26  ;;  %v636_v34 = vld [vmem:[%s315_s30] ss:$0 sm:$0xff]  ;;  %s786_s11 = scalar_lea.vmem %s1022_s7, 128  ;;  %p793_p1 = scmp.lt.s32.totalorder %s1022_s7, %s791_s12 }
  0x21   : > { %p787_p12 = scmp.ne.s32.totalorder %s1022_s7, %s786_s11  ;;  %p794_p2 = scmp.lt.s32.totalorder %s792_s13, %s786_s11 }
  0x23   : > { %p788_p13 = pnand %p787_p12, %p936_p4  ;;  %p795_p3 = por %p794_p2, %p793_p1 }
  0x25   : > { %701 = vmatpush3.bf16.xpose.msk.msra.mxu0 %vm965_vm2, %v699_v10  ;;  %p789_p0 = pneg %p788_p13 }
  0x26   : > { %702 = vmatprep.subr.bf16.mxu0 %v866_v0 }
  0x27   : > { %p796_p5 = pnand %p795_p3, %p789_p0 }
  0x2d   : > { %705 = vmatpush3.bf16.xpose.msk.msra.mxu0 %vm965_vm2, %v703_v13 }
  0x2e   : > { %706 = vmatprep.subr.bf16.mxu0 %v866_v0 }
  0x35   : > { %709 = vmatpush3.bf16.xpose.msk.msra.mxu0 %vm965_vm2, %v707_v16 }
  0x36   : > { %710 = vmatprep.subr.bf16.mxu0 %v866_v0 }
  0x3d   : > { %713 = vmatpush3.bf16.xpose.msk.msra.mxu0 %vm965_vm2, %v711_v19 }
  0x3e   : > { %714 = vmatprep.subr.bf16.mxu0 %v866_v0 }
  0x45   : > { %717 = vmatpush3.bf16.xpose.msk.msra.mxu0 %vm965_vm2, %v715_v22 }
  0x46   : > { %718 = vmatprep.subr.bf16.mxu0 %v866_v0 }
  0x4d   : > { %721 = vmatpush3.bf16.xpose.msk.msra.mxu0 %vm965_vm2, %v719_v25 }
  0x4e   : > { %722 = vmatprep.subr.bf16.mxu0 %v866_v0 }
  0x55   : > { %725 = vmatpush3.bf16.xpose.msk.msra.mxu0 %vm965_vm2, %v723_v28 }
  0x5c   : > { %692 = vmatmul.mubr.msk.f32.vlgmr.msra.gmra.mrb[0].mxu0 %vm333_vm1, %v316_v29 }
  0x9b   : > { %v460_v31 = vpop.permute.xlu0 %459 }
 0x12f   : > { %v451_v30 = vpop.f32.mrb[0].mxu0 }
 0x130   : > { %v456_v32 = vmul.f32 2.0, %v451_v30  ;;  %v693_v33 = vpop.f32.mrb[1].mxu0 }
 0x132   : > { %v462_v35 = vsub.f32 %v460_v31, %v456_v32 }
 0x134   : > { %v470_v36 = vadd.f32 %v636_v34, %v462_v35 }
 0x136   : > { %v471_v37 = vmax.f32 %v470_v36, 0.0 }
 0x138   : > { %472 = vst [vmem:[%s285_s6] sm:$0xff] %v471_v37 }
 0x139   : > { %799 = shalt.err (!%p796_p5)
}
 0x13a   : > { %s800_s14 = scalar_lea.hbm %s1020_s10, 128  ;;  %s804_s24 = scalar_lea.hbm %s1071_s4, 256 }
 0x13b   : > { %p801_p6 = scmp.ne.s32.totalorder %s1020_s10, %s800_s14  ;;  %p805_p10 = scmp.lt.u32.totalorder %s1020_s10, %s1071_s4 }
 0x13c   : > { %p806_p11 = scmp.lt.u32.totalorder %s804_s24, %s800_s14  ;;  %p808_p13 = scmp.lt.u32.totalorder %s800_s14, %s1020_s10 }
 0x13d   : > { %p802_p7 = pnand %p801_p6, %p936_p4 }
 0x13e   : > { %p807_p12 = por %p806_p11, %p805_p10 }
 0x13f   : > { %p803_p9 = pneg %p802_p7 }
 0x140   : > { %p809_p0 = por %p808_p13, %p807_p12 }
 0x142   : > { %p810_p1 = pnand %p809_p0, %p803_p9 }
 0x144   : > { %813 = shalt.err (!%p810_p1)
}
 0x145   : > { %726 = dma.vmem_to_hbm [thread:$0]  (%p936_p4), %s1022_s7, 128, %s1020_s10, %s474_s29  }
 0x146 PF: > { %p732_p2 = scmp.ge.s32.totalorder %s864_s20, 2  ;;  %s501_s5 = sand.u32 1, %s844_s15  }
 0x147   : > { %s502_s6 = scalar_lea.sflag [#allocation3], %s501_s5 }
 0x148   : > { %p729_p3 = pnand %p732_p2, %p943_p8 }
 0x14a   : > { %839 = dma.done.wait (!%p729_p3), %s502_s6, 128  }
 0x14b   : > { %841 = vsyncadd (!%p729_p3), %s502_s6, 4294967168  ;;  %s17_s20 = sadd.s32 1, %s864_s20   ;;  %s1076_s15 = smov %s848_s16 }
 0x14c   : > { %p14_p5 = scmp.ge.s32.totalorder %s17_s20, 4   ;;  %s1077_s16 = smov %s852_s17 }
 0x14d   : > { %s1078_s17 = smov %s949_s28  ;;  %s1079_s18 = smov %s860_s19 }
 0x14e   : > { %s1080_s19 = smov %s1082_s23  ;;  %16 = sbr.rel (!%p14_p5) target bundleno = 4 (0x4), region = 80 }
 0x155   :  { %507 = vsyncpa [#allocation3], 1 }
 0x156   :  { %509 = vsyncpa [#allocation3 + $0x1], 1 }

</bundles_post_ra>
